<compile_context>
chip_gen: v7x
topology: tpu7x:2x2x1
jax: 0.10.0
libtpu: 0.0.40
codegen_flags: <defaults>
</compile_context>

<pallas_src>
import functools
import math

import jax
import jax.numpy as jnp
from jax import lax
from jax.experimental import pallas as pl
from jax.experimental.pallas import tpu as pltpu


def _conv_block_kernel(xt_ref, w_ref, p_ref, o_ref, *,
                       Q, use_bias, use_layer_norm, eps, gelu_approximate):
    """
    xt_ref: (S*C_in, tt + max_q)   halo time-tile, phases stacked on sublanes
    w_ref : (C_out, Q*S*C_in)      folded conv weight (grid-invariant -> resident)
    p_ref : (C_out, 3)             packed [bias | ln_gamma | ln_beta] (resident)
    o_ref : (C_out, tt)            NCW output tile; lane axis = time (lane-dense stores)
    """
    c_out, tt = o_ref.shape

    # Conv1d as a single MXU contraction: build the (Q*S*C_in, tt) patch from Q static
    # lane-shifted views of the halo tile (static offsets -> no unaligned dynamic loads),
    # then one matmul.  Tap slots with q*S + r >= K have zero weight columns.
    pieces = [xt_ref[:, q:q + tt] for q in range(Q)]
    patch = pieces[0] if Q == 1 else jnp.concatenate(pieces, axis=0)

    acc = jnp.dot(w_ref[...], patch, preferred_element_type=jnp.float32)   # (C_out, tt)

    if use_bias:
        acc = acc + p_ref[:, 0:1]                       # (C_out,1) broadcast over lanes

    if use_layer_norm:
        # LayerNorm over channels (sublane axis) per output frame.  Channel sums go to
        # the MXU (ones-row matmuls) to keep them off the saturating VALU slot.
        ones_row = jnp.ones((1, c_out), jnp.float32)
        inv_n = jnp.float32(1.0 / c_out)
        mean = jnp.dot(ones_row, acc, preferred_element_type=jnp.float32) * inv_n
        d = acc - mean
        var = jnp.dot(ones_row, d * d, preferred_element_type=jnp.float32) * inv_n
        var = jnp.maximum(var, jnp.float32(0.0))        # guard tiny negative cancellation
        acc = d * lax.rsqrt(var + jnp.float32(eps))
        acc = acc * p_ref[:, 1:2] + p_ref[:, 2:3]

    if gelu_approximate:
        # tanh GELU: transcendental lands on the EUP slot (not torch default).
        c = jnp.float32(0.7978845608028654)             # sqrt(2/pi)
        y = 0.5 * acc * (1.0 + jnp.tanh(c * (acc + 0.044715 * acc * acc * acc)))
    else:
        # Exact erf GELU -- matches torch.nn.functional.gelu default.
        y = 0.5 * acc * (1.0 + lax.erf(acc * jnp.float32(0.7071067811865476)))

    o_ref[...] = y.astype(o_ref.dtype)


def conv_layer_block(x, weight, bias, ln_gamma, ln_beta, *,
                     kernel_size: int, stride: int, use_layer_norm: bool,
                     eps: float = 1e-5, time_tile: int = 512,
                     gelu_approximate: bool = False, use_bf16_mxu: bool = False,
                     vmem_limit_bytes: int = 32 * 1024 * 1024):
    """x: [B, C_in, T_in] float32.  Returns [B, C_out, T_out] (NCW), like the torch module."""
    B, C_in, T_in = x.shape
    C_out = weight.shape[0]
    K, S = kernel_size, stride
    T_out = (T_in - K) // S + 1
    assert T_out > 0, "input too short for this kernel_size/stride"

    Q = -(-K // S)               # taps grouped by downsampled offset q = k // S
    max_q = (K - 1) // S         # halo frames appended to each tile (= Q - 1)
    SC = S * C_in

    # --- time tile: lane-dense (multiple of 128) whenever T_out allows; sized so that
    #     2x input block + 2x output block + weights + live temps fit the VMEM budget.
    if T_out < 128:
        tt = T_out
    else:
        budget = int(0.75 * vmem_limit_bytes)

        def footprint(t):
            in_b = 2 * SC * (t + max_q) * 4            # double-buffered input block
            out_b = 2 * C_out * t * 4                  # double-buffered output block
            w_b = 2 * C_out * Q * SC * 4               # folded weight (double-buffered)
            tmp_b = (Q * SC + 5 * C_out) * t * 4       # patch + live epilogue temps
            return in_b + out_b + w_b + tmp_b

        tt = max(128, (min(time_tile, T_out) // 128) * 128)
        while tt > 128 and footprint(tt) > budget:
            tt -= 128
    num_t = -(-T_out // tt)                            # cdiv; last output tile masked
    tt_in = tt + max_q

    # --- de-interleave x into its S stride-phases (same total bytes as x, no im2col
    #     inflation); lanes become downsampled time, phases stacked on the channel axis.
    T_phase = num_t * tt + max_q
    Lx = S * T_phase
    x_fit = x[:, :, :Lx]
    if x_fit.shape[2] < Lx:
        x_fit = jnp.pad(x_fit, ((0, 0), (0, 0), (0, Lx - x_fit.shape[2])))
    arr = x_fit.reshape(B, C_in, T_phase, S)
    arr = jnp.transpose(arr, (0, 3, 1, 2)).reshape(B, SC, T_phase)   # rows = r*C_in + c

    # --- overlapping time tiles with halo: [B, num_t, S*C_in, tt_in]
    if max_q == 0:
        tiles4 = arr[:, :, :num_t * tt].reshape(B, SC, num_t, tt)
    elif max_q < tt:
        arr2 = jnp.pad(arr, ((0, 0), (0, 0), (0, tt - max_q)))       # len (num_t+1)*tt
        main = arr2[:, :, :num_t * tt].reshape(B, SC, num_t, tt)
        halo = arr2[:, :, tt:(num_t + 1) * tt].reshape(B, SC, num_t, tt)[:, :, :, :max_q]
        tiles4 = jnp.concatenate([main, halo], axis=-1)
    else:
        # rare (halo spans multiple tiles): general gather fallback
        idx = (jnp.arange(num_t)[:, None] * tt + jnp.arange(tt_in)[None, :]).reshape(-1)
        tiles4 = jnp.take(arr, idx, axis=-1).reshape(B, SC, num_t, tt_in)
    tiles = jnp.transpose(tiles4, (0, 2, 1, 3))                      # [B, num_t, SC, tt_in]

    # --- fold K taps into one contraction: weight -> (C_out, Q*S*C_in); slots with
    #     q*S + r >= K get zero columns (they touch halo lanes but contribute nothing).
    w_t = jnp.transpose(weight, (0, 2, 1)).astype(jnp.float32)       # (C_out, K, C_in)
    if Q * S > K:
        w_t = jnp.pad(w_t, ((0, 0), (0, Q * S - K), (0, 0)))
    w2 = w_t.reshape(C_out, Q * S * C_in)

    mxu_dtype = jnp.bfloat16 if use_bf16_mxu else jnp.float32
    tiles = tiles.astype(mxu_dtype)
    w2 = w2.astype(mxu_dtype)

    use_bias = bias is not None
    b_vec = (bias if use_bias else jnp.zeros((C_out,), jnp.float32)).astype(jnp.float32)
    g_vec = (ln_gamma if (use_layer_norm and ln_gamma is not None)
             else jnp.ones((C_out,), jnp.float32)).astype(jnp.float32)
    bt_vec = (ln_beta if (use_layer_norm and ln_beta is not None)
              else jnp.zeros((C_out,), jnp.float32)).astype(jnp.float32)
    params = jnp.stack([b_vec, g_vec, bt_vec], axis=1)               # [C_out, 3]

    kernel = functools.partial(
        _conv_block_kernel, Q=Q, use_bias=use_bias,
        use_layer_norm=use_layer_norm, eps=eps, gelu_approximate=gelu_approximate)

    out = pl.pallas_call(
        kernel,
        out_shape=jax.ShapeDtypeStruct((B, C_out, T_out), jnp.float32),
        grid=(B, num_t),
        in_specs=[
            # halo-tiled input block: changes every grid step -> pipelined (double-buffered)
            pl.BlockSpec((None, None, SC, tt_in), lambda b, t: (b, t, 0, 0)),
            # folded weight + packed [bias|gamma|beta]: grid-invariant, small -> resident
            pl.BlockSpec((C_out, Q * S * C_in), lambda b, t: (0, 0)),
            pl.BlockSpec((C_out, 3), lambda b, t: (0, 0)),
        ],
        out_specs=pl.BlockSpec((None, C_out, tt), lambda b, t: (b, 0, t)),
        compiler_params=pltpu.CompilerParams(
            dimension_semantics=("parallel", "parallel"),
            vmem_limit_bytes=vmem_limit_bytes),
    )(tiles, w2, params)
    return out


def _reference(x, weight, bias, ln_gamma, ln_beta, *, stride, use_layer_norm, eps=1e-5):
    """Pure-JAX reference mirroring the PyTorch forward."""
    y = lax.conv_general_dilated(
        x, weight, window_strides=(stride,), padding="VALID",
        dimension_numbers=("NCH", "OIH", "NCH"))
    if bias is not None:
        y = y + bias[None, :, None]
    if use_layer_norm:
        mean = jnp.mean(y, axis=1, keepdims=True)
        var = jnp.mean((y - mean) ** 2, axis=1, keepdims=True)
        y = (y - mean) / jnp.sqrt(var + eps)
        y = y * ln_gamma[None, :, None] + ln_beta[None, :, None]
    return 0.5 * y * (1.0 + lax.erf(y / jnp.sqrt(2.0)))


if __name__ == "__main__":
    # Conv1d(4 -> 32, k=3, s=2, bias=True) + LayerNorm-over-channels + GELU.
    B, C_in, T_in = 2, 4, 16
    C_out, K, S = 32, 3, 2

    key = jax.random.PRNGKey(0)
    k_x, k_w, k_b, k_g, k_bt, k_x2 = jax.random.split(key, 6)
    x = jax.random.normal(k_x, (B, C_in, T_in), dtype=jnp.float32)
    bound = 1.0 / math.sqrt(C_in * K)
    weight = jax.random.uniform(k_w, (C_out, C_in, K), jnp.float32, -bound, bound)
    bias = jax.random.uniform(k_b, (C_out,), jnp.float32, -bound, bound)
    ln_gamma = 1.0 + 0.1 * jax.random.normal(k_g, (C_out,), jnp.float32)
    ln_beta = 0.1 * jax.random.normal(k_bt, (C_out,), jnp.float32)

    # Small-shape check (single time tile, with LayerNorm).
    out = conv_layer_block(x, weight, bias, ln_gamma, ln_beta,
                           kernel_size=K, stride=S, use_layer_norm=True)
    out = jax.block_until_ready(out)
    ref = _reference(x, weight, bias, ln_gamma, ln_beta, stride=S, use_layer_norm=True)
    assert out.shape == (B, C_out, (T_in - K) // S + 1)
    assert jnp.allclose(out, ref, atol=2e-5, rtol=2e-5), "mismatch vs reference (small)"

    # No-LayerNorm variant (layer_norm=None path of the module).
    out_nl = conv_layer_block(x, weight, bias, None, None,
                              kernel_size=K, stride=S, use_layer_norm=False)
    out_nl = jax.block_until_ready(out_nl)
    ref_nl = _reference(x, weight, bias, None, None, stride=S, use_layer_norm=False)
    assert jnp.allclose(out_nl, ref_nl, atol=2e-5, rtol=2e-5), "mismatch vs reference (no LN)"

    # Multi-tile check: exercises the halo-tiled 128-wide lane-dense time tiles, the
    # grid pipeline, and masked writes on the partial edge tile.
    T_in2 = 300
    x2 = jax.random.normal(k_x2, (B, C_in, T_in2), dtype=jnp.float32)
    out2 = conv_layer_block(x2, weight, bias, ln_gamma, ln_beta,
                            kernel_size=K, stride=S, use_layer_norm=True)
    out2 = jax.block_until_ready(out2)
    ref2 = _reference(x2, weight, bias, ln_gamma, ln_beta, stride=S, use_layer_norm=True)
    assert out2.shape == (B, C_out, (T_in2 - K) // S + 1)
    assert jnp.allclose(out2, ref2, atol=2e-5, rtol=2e-5), "mismatch vs reference (tiled)"

    # TODO(synk): GroupNorm(out_channels, out_channels) layer_norm variant (normalizes
    # over time per channel) needs a full-sequence reduction pass; only the None /
    # LayerNorm-over-channels variants are implemented.
    print("KERNEL_OK")
</pallas_src>

<mosaic_0001>
module attributes {stable_mosaic.version = 11 : i64} {
  func.func @_conv_block_kernel(%arg0: i32, %arg1: i32, %arg2: memref<1x1x8x8xf32, #tpu.memory_space<vmem>>, %arg3: memref<32x16xf32, #tpu.memory_space<vmem>>, %arg4: memref<32x3xf32, #tpu.memory_space<vmem>>, %arg5: memref<1x32x7xf32, #tpu.memory_space<vmem>>) attributes {dimension_semantics = [#tpu.dimension_semantics<parallel>, #tpu.dimension_semantics<parallel>], iteration_bounds = array<i64: 2, 1>, scalar_prefetch = 0 : i64, scratch_operands = 0 : i64, tpu.core_type = #tpu.core_type<tc>, window_params = [{transform_indices = @transform_0, window_bounds = array<i64: 1, 1, 8, 8>}, {pipeline_mode = #tpu.pipeline_mode<synchronous>, transform_indices = @transform_1, window_bounds = array<i64: 32, 16>}, {pipeline_mode = #tpu.pipeline_mode<synchronous>, transform_indices = @transform_2, window_bounds = array<i64: 32, 3>}, {transform_indices = @transform_3, window_bounds = array<i64: 1, 32, 7>}]} {
    %c0 = arith.constant 0 : index
    %c0_0 = arith.constant 0 : index
    %c0_1 = arith.constant 0 : index
    %c0_2 = arith.constant 0 : index
    %0 = vector.load %arg2[%c0, %c0_0, %c0_1, %c0_2] : memref<1x1x8x8xf32, #tpu.memory_space<vmem>>, vector<1x1x8x7xf32>
    %1 = vector.shape_cast %0 : vector<1x1x8x7xf32> to vector<8x7xf32>
    %c0_3 = arith.constant 0 : index
    %c0_4 = arith.constant 0 : index
    %c0_5 = arith.constant 0 : index
    %c1 = arith.constant 1 : index
    %2 = vector.load %arg2[%c0_3, %c0_4, %c0_5, %c1] : memref<1x1x8x8xf32, #tpu.memory_space<vmem>>, vector<1x1x8x7xf32>
    %3 = vector.shape_cast %2 : vector<1x1x8x7xf32> to vector<8x7xf32>
    %4 = tpu.concatenate %1, %3 in 0 : vector<8x7xf32>, vector<8x7xf32> -> vector<16x7xf32>
    %c0_6 = arith.constant 0 : index
    %c0_7 = arith.constant 0 : index
    %5 = vector.load %arg3[%c0_6, %c0_7] : memref<32x16xf32, #tpu.memory_space<vmem>>, vector<32x16xf32>
    %cst = arith.constant dense<0.000000e+00> : vector<32x7xf32>
    %6 = tpu.matmul %5, %4, %cst {dimension_numbers = #tpu.dot_dimension_numbers<[1], [0], [0], [1], [0, 0, 1, 1], [], []>} : vector<32x16xf32>, vector<16x7xf32>, vector<32x7xf32> -> vector<32x7xf32>
    %c0_8 = arith.constant 0 : index
    %c0_9 = arith.constant 0 : index
    %7 = vector.load %arg4[%c0_8, %c0_9] : memref<32x3xf32, #tpu.memory_space<vmem>>, vector<32x1xf32>
    %8 = vector.broadcast %7 : vector<32x1xf32> to vector<32x7xf32>
    %9 = arith.addf %6, %8 : vector<32x7xf32>
    %cst_10 = arith.constant 1.000000e+00 : f32
    %10 = vector.broadcast %cst_10 : f32 to vector<1x32xf32>
    %cst_11 = arith.constant dense<0.000000e+00> : vector<1x7xf32>
    %11 = tpu.matmul %10, %9, %cst_11 {dimension_numbers = #tpu.dot_dimension_numbers<[1], [0], [0], [1], [0, 0, 1, 1], [], []>} : vector<1x32xf32>, vector<32x7xf32>, vector<1x7xf32> -> vector<1x7xf32>
    %cst_12 = arith.constant 3.125000e-02 : f32
    %12 = vector.broadcast %cst_12 : f32 to vector<1x7xf32>
    %13 = arith.mulf %11, %12 : vector<1x7xf32>
    %14 = vector.broadcast %13 : vector<1x7xf32> to vector<32x7xf32>
    %15 = arith.subf %9, %14 : vector<32x7xf32>
    %16 = arith.mulf %15, %15 : vector<32x7xf32>
    %cst_13 = arith.constant dense<0.000000e+00> : vector<1x7xf32>
    %17 = tpu.matmul %10, %16, %cst_13 {dimension_numbers = #tpu.dot_dimension_numbers<[1], [0], [0], [1], [0, 0, 1, 1], [], []>} : vector<1x32xf32>, vector<32x7xf32>, vector<1x7xf32> -> vector<1x7xf32>
    %cst_14 = arith.constant 3.125000e-02 : f32
    %18 = vector.broadcast %cst_14 : f32 to vector<1x7xf32>
    %19 = arith.mulf %17, %18 : vector<1x7xf32>
    %cst_15 = arith.constant 0.000000e+00 : f32
    %20 = vector.broadcast %cst_15 : f32 to vector<1x7xf32>
    %21 = arith.maximumf %19, %20 : vector<1x7xf32>
    %cst_16 = arith.constant 9.99999974E-6 : f32
    %22 = vector.broadcast %cst_16 : f32 to vector<1x7xf32>
    %23 = arith.addf %21, %22 : vector<1x7xf32>
    %24 = math.rsqrt %23 : vector<1x7xf32>
    %25 = vector.broadcast %24 : vector<1x7xf32> to vector<32x7xf32>
    %26 = arith.mulf %15, %25 : vector<32x7xf32>
    %c0_17 = arith.constant 0 : index
    %c1_18 = arith.constant 1 : index
    %27 = vector.load %arg4[%c0_17, %c1_18] : memref<32x3xf32, #tpu.memory_space<vmem>>, vector<32x1xf32>
    %28 = vector.broadcast %27 : vector<32x1xf32> to vector<32x7xf32>
    %29 = arith.mulf %26, %28 : vector<32x7xf32>
    %c0_19 = arith.constant 0 : index
    %c2 = arith.constant 2 : index
    %30 = vector.load %arg4[%c0_19, %c2] : memref<32x3xf32, #tpu.memory_space<vmem>>, vector<32x1xf32>
    %31 = vector.broadcast %30 : vector<32x1xf32> to vector<32x7xf32>
    %32 = arith.addf %29, %31 : vector<32x7xf32>
    %cst_20 = arith.constant 5.000000e-01 : f32
    %33 = vector.broadcast %cst_20 : f32 to vector<32x7xf32>
    %34 = arith.mulf %33, %32 : vector<32x7xf32>
    %cst_21 = arith.constant 0.707106769 : f32
    %35 = vector.broadcast %cst_21 : f32 to vector<32x7xf32>
    %36 = arith.mulf %32, %35 : vector<32x7xf32>
    %37 = math.erf %36 : vector<32x7xf32>
    %cst_22 = arith.constant 1.000000e+00 : f32
    %38 = vector.broadcast %cst_22 : f32 to vector<32x7xf32>
    %39 = arith.addf %38, %37 : vector<32x7xf32>
    %40 = arith.mulf %34, %39 : vector<32x7xf32>
    %c0_23 = arith.constant 0 : index
    %c0_24 = arith.constant 0 : index
    %c0_25 = arith.constant 0 : index
    %41 = vector.load %arg5[%c0_23, %c0_24, %c0_25] : memref<1x32x7xf32, #tpu.memory_space<vmem>>, vector<1x32x7xf32>
    %42 = vector.shape_cast %41 : vector<1x32x7xf32> to vector<32x7xf32>
    %43 = vector.shape_cast %40 : vector<32x7xf32> to vector<1x32x7xf32>
    tpu.vector_store %arg5[%c0_23, %c0_24, %c0_25], %43 {strides = array<i32>} : memref<1x32x7xf32, #tpu.memory_space<vmem>>, vector<1x32x7xf32>,
    return
  }
  func.func @transform_0(%arg0: i32, %arg1: i32) -> (i32, i32, i32, i32) {
    %c0_i32 = arith.constant 0 : i32
    %c0_i32_0 = arith.constant 0 : i32
    %c0_i32_1 = arith.constant 0 : i32
    return %arg0, %arg1, %c0_i32, %c0_i32_0 : i32, i32, i32, i32
  }
  func.func @transform_1(%arg0: i32, %arg1: i32) -> (i32, i32) {
    %c0_i32 = arith.constant 0 : i32
    %c0_i32_0 = arith.constant 0 : i32
    %c0_i32_1 = arith.constant 0 : i32
    return %c0_i32, %c0_i32_0 : i32, i32
  }
  func.func @transform_2(%arg0: i32, %arg1: i32) -> (i32, i32) {
    %c0_i32 = arith.constant 0 : i32
    %c0_i32_0 = arith.constant 0 : i32
    %c0_i32_1 = arith.constant 0 : i32
    return %c0_i32, %c0_i32_0 : i32, i32
  }
  func.func @transform_3(%arg0: i32, %arg1: i32) -> (i32, i32, i32) {
    %c0_i32 = arith.constant 0 : i32
    %c0_i32_0 = arith.constant 0 : i32
    return %arg0, %c0_i32, %arg1 : i32, i32, i32
  }
}

</mosaic_0001>

<bundles_post_ra>
// kernel: tpu_custom_call.1
= control target key start
LH: loop header
LB: loop body
LE: loop exit
PB: predicated region body
PF: predicated region fallthrough
CT: control target
= control target key end

     0   :  { %s825_s12 = smov 0   ;;  %s827_s13 = smov 0   ;;  %s892_s0 = inlined_call_operand.vmem [shape: f32[2,1,8,8], index: 0, kind: input, shape index: {}]   ;;  %s893_s1 = inlined_call_operand.vmem [shape: f32[32,16], index: 1, kind: input, shape index: {}]   ;;  %s894_s2 = inlined_call_operand.vmem [shape: f32[32,3], index: 2, kind: input, shape index: {}]   ;;  %s895_s3 = inlined_call_operand.vmem [shape: f32[2,32,7], index: 3, kind: output, shape index: {}]  }
   0x1   :  { %s829_s14 = smov 0  }
   0x2 LB: > { %s25_s15 = sadd.s32 1, %s791_s13  ;;  %p648_p0 = scmp.ge.s32.totalorder %s795_s14, 1  ;;  %s795_s14 = sphi %s829_s14, %s13_s14   ;;  %s791_s13 = sphi %s827_s13, %s897_s13   ;;  %s787_s12 = sphi %s825_s12, %s896_s12  }
   0x3   : > { %p27_p1 = scmp.ge.s32.totalorder %s25_s15, 2  ;;  %p155_p2 = scmp.lt.s32.totalorder %s795_s14, 3 }
   0x5   : > { %s899_s15 = smov (%p27_p1, %s25_s15), 0  ;;  %p156_p3 = pnand %p648_p0, %p155_p2 }
   0x6   : > { %p184_p4 = scmp.lt.s32.totalorder (!%p156_p3), %s787_s12, 1  ;;  %v204_v0 = vld [vmem:[%s893_s1] sm:$0xff] (!%p156_p3)  ;;  %vm232_vm0 = vcmask (!%p156_p3), 130048   ;;  %v209_v1 = vld [vmem:[%s894_s2 + $0x8] sm:$0xff] (!%p156_p3)  ;;  %v797_v2 = vmov (!%p156_p3), 0   ;;  %s798_s24 = smov (!%p156_p3), 127   ;;  %v405_v31 = vlaneseq (!%p156_p3) }
   0x7   : > { %159 = sbr.rel (%p156_p3) target bundleno = 850 (0x352), region = 32  ;;  %681 = vmatprep.mubr.msk.f32.mxu0 (!%p156_p3), %vm232_vm0, %v204_v0  ;;  %758 = vset.pattern.permute.xlu1 (!%p156_p3), %v797_v2  ;;  %v210_v4 = vld [vmem:[%s894_s2 + $0x10] sm:$0xff] (!%p156_p3)  ;;  %v208_v5 = vld [vmem:[%s894_s2] sm:$0xff] (!%p156_p3)  ;;  %v211_v6 = vld [vmem:[%s894_s2 + $0x18] sm:$0xff] (!%p156_p3)  ;;  %v799_v12 = vmov (!%p156_p3), 0.0|0.0   ;;  %vm800_vm1 = vmmov (!%p156_p3), 0  }
   0x8   : > { %757 = vset.pattern.permute.xlu0 (!%p156_p3), %v797_v2  ;;  %219 = vperm.xlu1 (!%p156_p3), %758, %v209_v1   ;;  %v205_v9 = vld [vmem:[%s893_s1 + $0x8] sm:$0xff] (!%p156_p3)  ;;  %v206_v10 = vld [vmem:[%s893_s1 + $0x10] sm:$0xff] (!%p156_p3)  ;;  %v207_v11 = vld [vmem:[%s893_s1 + $0x18] sm:$0xff] (!%p156_p3)  ;;  %v801_v13 = vmov (!%p156_p3), 0.0   ;;  %vm330_vm2 = vcmask (!%p156_p3), 261120   ;;  %v802_v28 = vmov (!%p156_p3), 1.0  }
   0x9   : > { %713 = vmatprep.subr.bf16.mxu1 (!%p156_p3), %v799_v12  ;;  %695 = vmatprep.mubr.msk.f32.mxu1 (!%p156_p3), %vm800_vm1, %v801_v13  ;;  %v803_v29 = vmov (!%p156_p3), 1   ;;  %v804_v30 = vmov (!%p156_p3), 2   ;;  %v406_v32 = vshrl.u32 (!%p156_p3), %v405_v31, 7  ;;  %vm559_vm3 = vcmask (!%p156_p3), 56320  }
   0xb   : > { %v407_v33 = vsub.s32 (!%p156_p3), 0, %v406_v32 }
   0xc   : > { %224 = vperm.xlu1 (!%p156_p3), %758, %v210_v4  }
   0xe   : > { %s901_s12 = smov (!%p184_p4, %s787_s12), 1 }
   0xf   : > { %s649_s18 = sshll.u32 %s901_s12, 3  ;;  %s660_s10 = sshll.u32 %s901_s12, 5 }
  0x10   : > { %s190_s23 = scalar_lea.vmem %s892_s0, %s649_s18  ;;  %229 = vperm.xlu1 %758, %v211_v6   ;;  %s198_s17 = scalar_lea.vmem %s895_s3, %s660_s10 }
  0x11   : > { %v199_v3 = vld [vmem:[%s190_s23] sm:$0xff] }
  0x12   : > { %201 = vrot.lane.b32.xlu0 %v199_v3, %s798_s24 }
  0x14   : > { %760 = vset.pattern.permute.xlu1 %v803_v29 }
  0x15   : > { %504 = vperm.xlu1 %760, %v209_v1  }
  0x16   : > { %214 = vperm.xlu0 %757, %v208_v5  }
  0x19   : > { %508 = vperm.xlu1 %760, %v210_v4  }
  0x1a   : > { %759 = vset.pattern.permute.xlu0 %v803_v29 }
  0x1b   : > { %500 = vperm.xlu0 %759, %v208_v5  }
  0x1d   : > { %761 = vset.pattern.permute.xlu1 %v804_v30 }
  0x1e   : > { %520 = vperm.xlu1 %761, %v208_v5  }
  0x1f   : > { %512 = vperm.xlu0 %759, %v211_v6  }
  0x22   : > { %528 = vperm.xlu1 %761, %v210_v4  }
  0x23   : > { %762 = vset.pattern.permute.xlu0 %v804_v30 }
  0x24   : > { %524 = vperm.xlu0 %762, %v209_v1  }
  0x26   : > { %532 = vperm.xlu1 %761, %v211_v6  }
  0x84   : > { %v202_v7 = vpop.permute.xlu0 %201 }
  0x85   : > { %v709_v8 = vpack.c.bf16 %v202_v7, %v199_v3 }
  0x87   : > { %710 = vmatprep.subr.bf16.mxu0 %v709_v8  ;;  %v220_v14 = vpop.permute.xlu1 %219 }
  0x88   : > { %712 = vmatpush3.bf16.msra.mxu0 %v709_v8 }
  0x89   : > { %719 = vmatprep.subr.bf16.mxu0 %v799_v12 }
  0x8b   : > { %682 = vmatmul.mubr.msk.f32.vlgmr.msra.gmra.mrb[0].mxu0 %vm232_vm0, %v205_v9  ;;  %v225_v15 = vpop.permute.xlu1 %224 }
  0x8c   : > { %684 = vmatprep.mubr.msk.f32.mxu0 %vm232_vm0, %v206_v10 }
  0x8f   : > { %685 = vmatmul.mubr.msk.f32.gmra.mrb[2].mxu0 %vm232_vm0, %v207_v11  ;;  %v230_v21 = vpop.permute.xlu1 %229 }
  0x90   : > { %706 = vmatprep.mubr.msk.f32.mxu0 %vm800_vm1, %v801_v13 }
  0x94   : > { %v505_v48 = vpop.permute.xlu1 %504 }
  0x95   : > { %v215_v16 = vpop.permute.xlu0 %214 }
  0x98   : > { %v509_v54 = vpop.permute.xlu1 %508 }
  0x9a   : > { %v501_v56 = vpop.permute.xlu0 %500 }
  0x9d   : > { %v521_v55 = vpop.permute.xlu1 %520 }
  0x9e   : > { %v513_v59 = vpop.permute.xlu0 %512 }
  0xa1   : > { %v529_v58 = vpop.permute.xlu1 %528 }
  0xa3   : > { %v525_v1 = vpop.permute.xlu0 %524 }
  0xa5   : > { %v533_v6 = vpop.permute.xlu1 %532 }
 0x15e   : > { %v683_v17 = vpop.f32.mrb[0].mxu0 }
 0x15f   : > { %v317_v18 = vadd.f32 %v683_v17, %v220_v14  ;;  %v311_v19 = vpop.f32.mrb[1].mxu0 }
 0x160   : > { %v312_v20 = vadd.f32 %v311_v19, %v215_v16 }
 0x162   : > { %v686_v22 = vpop.f32.mrb[2].mxu0  ;;  %v714_v23 = vpack.c.bf16 %v317_v18, %v312_v20 }
 0x163   : > { %v327_v24 = vadd.f32 %v686_v22, %v230_v21  ;;  %v321_v25 = vpop.f32.mrb[3].mxu0 }
 0x164   : > { %v322_v26 = vadd.f32 %v321_v25, %v225_v15  ;;  %715 = vmatpush3.bf16.msra.mxu1 %v714_v23 }
 0x165   : > { %716 = vmatprep.subr.bf16.mxu1 %v799_v12 }
 0x166   : > { %v717_v27 = vpack.c.bf16 %v327_v24, %v322_v26 }
 0x168   : > { %718 = vmatpush3.bf16.msra.mxu1 %v717_v27 }
 0x16b   : > { %696 = vmatmul.mubr.msk.f32.vlgmr.msra.gmra.mrb[0].mxu1 %vm330_vm2, %v802_v28 }
 0x23e   : > { %v400_v34 = vpop.f32.mrb[0].mxu1 }
 0x23f   : > { %v404_v35 = vmul.f32 0.03125, %v400_v34  ;;  %v697_v36 = vpop.f32.mrb[1].mxu1 }
 0x241   : > { %v408_v37 = vrot.slane %v404_v35, %v407_v33 }
 0x243   : > { %v409_v38 = vsub.f32 %v312_v20, %v408_v37  ;;  %v410_v39 = vsub.f32 %v317_v18, %v408_v37  ;;  %v411_v40 = vsub.f32 %v322_v26, %v408_v37  ;;  %v412_v41 = vsub.f32 %v327_v24, %v408_v37 }
 0x245   : > { %v413_v42 = vmul.f32 %v409_v38, %v409_v38  ;;  %v414_v43 = vmul.f32 %v410_v39, %v410_v39  ;;  %v415_v45 = vmul.f32 %v411_v40, %v411_v40  ;;  %v416_v46 = vmul.f32 %v412_v41, %v412_v41 }
 0x247   : > { %v720_v44 = vpack.c.bf16 %v414_v43, %v413_v42  ;;  %v723_v47 = vpack.c.bf16 %v416_v46, %v415_v45 }
 0x249   : > { %721 = vmatpush3.bf16.msra.mxu0 %v720_v44 }
 0x24a   : > { %722 = vmatprep.subr.bf16.mxu0 %v799_v12 }
 0x24d   : > { %724 = vmatpush3.bf16.msra.mxu0 %v723_v47 }
 0x250   : > { %707 = vmatmul.mubr.msk.f32.vlgmr.msra.gmra.mrb[4].mxu0 %vm330_vm2, %v802_v28 }
 0x323   : > { %v483_v49 = vpop.f32.mrb[4].mxu0 }
 0x324   : > { %v487_v50 = vmul.f32 0.03125, %v483_v49  ;;  %v708_v51 = vpop.f32.mrb[5].mxu0 }
 0x326   : > { %v488_v52 = vmax.f32 %v487_v50, 0.0 }
 0x328   : > { %v489_v53 = vadd.f32 1e-05, %v488_v52 }
 0x32a   : > { %763 = vrsqrt.f32 %v489_v53 }
 0x334   : > { %v764_v57 = vpop.eup %763 }
 0x335   : > { %v494_v60 = vrot.slane %v764_v57, %v407_v33 }
 0x337   : > { %v497_v61 = vmul.f32 %v494_v60, %v411_v40  ;;  %v495_v62 = vmul.f32 %v494_v60, %v409_v38  ;;  %v498_v63 = vmul.f32 %v494_v60, %v412_v41  ;;  %v496_v0 = vmul.f32 %v494_v60, %v410_v39 }
 0x339   : > { %v517_v2 = vmul.f32 %v509_v54, %v497_v61  ;;  %v515_v3 = vmul.f32 %v501_v56, %v495_v62  ;;  %v518_v4 = vmul.f32 %v513_v59, %v498_v63  ;;  %v516_v5 = vmul.f32 %v505_v48, %v496_v0 }
 0x33b   : > { %v535_v7 = vadd.f32 %v521_v55, %v515_v3  ;;  %v537_v8 = vadd.f32 %v529_v58, %v517_v2  ;;  %v538_v9 = vadd.f32 %v533_v6, %v518_v4  ;;  %v536_v10 = vadd.f32 %v525_v1, %v516_v5 }
 0x33d   : > { %v543_v11 = vmul.f32 0.70710677, %v535_v7  ;;  %v545_v12 = vmul.f32 0.70710677, %v537_v8  ;;  %v546_v13 = vmul.f32 0.70710677, %v538_v9 }
 0x33e   : > { %v544_v14 = vmul.f32 0.70710677, %v536_v10  ;;  %v539_v17 = vmul.f32 0.5, %v535_v7  ;;  %v541_v20 = vmul.f32 0.5, %v537_v8  ;;  %v542_v24 = vmul.f32 0.5, %v538_v9 }
 0x33f   : > { %765 = verf.f32 %v543_v11  ;;  %v540_v27 = vmul.f32 0.5, %v536_v10 }
 0x340   : > { %767 = verf.f32 %v545_v12 }
 0x341   : > { %769 = verf.f32 %v546_v13 }
 0x342   : > { %771 = verf.f32 %v544_v14 }
 0x349   : > { %v766_v15 = vpop.eup %765 }
 0x34a   : > { %v768_v16 = vpop.eup %767  ;;  %v551_v18 = vadd.f32 1.0, %v766_v15 }
 0x34b   : > { %v770_v19 = vpop.eup %769  ;;  %v553_v21 = vadd.f32 1.0, %v768_v16 }
 0x34c   : > { %v772_v22 = vpop.eup %771  ;;  %v555_v23 = vmul.f32 %v551_v18, %v539_v17  ;;  %v554_v25 = vadd.f32 1.0, %v770_v19 }
 0x34d   : > { %v557_v26 = vmul.f32 %v553_v21, %v541_v20  ;;  %v552_v28 = vadd.f32 1.0, %v772_v22 }
 0x34e   : > { %560 = vst.msk [vmem:[%s198_s17] sm:$0xff] %vm559_vm3, %v555_v23  ;;  %v558_v29 = vmul.f32 %v554_v25, %v542_v24 }
 0x34f   : > { %562 = vst.msk [vmem:[%s198_s17 + $0x10] sm:$0xff] %vm559_vm3, %v557_v26  ;;  %v556_v30 = vmul.f32 %v552_v28, %v540_v27 }
 0x350   : > { %563 = vst.msk [vmem:[%s198_s17 + $0x18] sm:$0xff] %vm559_vm3, %v558_v29 }
 0x351   : > { %561 = vst.msk [vmem:[%s198_s17 + $0x8] sm:$0xff] %vm559_vm3, %v556_v30 }
 0x352 PF: > { %s13_s14 = sadd.s32 1, %s795_s14   ;;  %s896_s12 = smov %s791_s13 }
 0x353   : > { %p10_p5 = scmp.ge.s32.totalorder %s13_s14, 4   ;;  %s897_s13 = smov %s899_s15 }
 0x355   :  { %12 = sbr.rel (!%p10_p5) target bundleno = 2 (0x2), region = 62 }

</bundles_post_ra>
